<compile_context>
chip_gen: v7x
topology: tpu7x:2x2x1
jax: 0.10.0
libtpu: 0.0.40
codegen_flags: <defaults>
</compile_context>

<pallas_src>
import jax
import jax.numpy as jnp
from jax.experimental import pallas as pl
from jax.experimental.pallas import tpu as pltpu

MAX_TILE_B = 4096  # rows per grid step for large B (fits default scoped VMEM)


def _round_up(n, m):
    return ((n + m - 1) // m) * m


def _elementwise_dtype():
    """bf16 bias/ReLU on chips with a bf16 VALU (v6e/v7x); f32 elsewhere (v5e)."""
    try:
        kind = jax.devices()[0].device_kind.lower()
    except Exception:
        return jnp.float32
    if "v6" in kind or "v7" in kind or "7x" in kind:
        return jnp.bfloat16
    return jnp.float32


def _choose_tile_b(batch, max_tile_b=MAX_TILE_B):
    """Rows per grid step.

    * tiny batches: a single right-sized tile (multiple of 8 for (8,128) layout)
    * moderate batches: aim for >= 2 tiles so both v7x TensorCores get work
    * large batches: cap at max_tile_b to amortize per-step overhead without
      pushing VMEM (v7x: 64 MiB physical / 32 MiB default scoped; v5e: 16 MiB)
    """
    if batch <= 512:
        return _round_up(batch, 8)
    return min(_round_up(pl.cdiv(batch, 2), 256), max_tile_b)


def _tilt_kernel(x_ref, w1_ref, b1_ref, w2_ref, b2_ref, w3_ref, b3_ref, out_ref):
    # x_ref:  [tile_b, D_in] f32 (cast to bf16 here; saves a wrapper HBM pass)
    # w1/w2:  [in, out] bf16, VMEM-resident (constant index_maps)
    # b1:     [1, H1] in the elementwise dtype (bf16 on v6e/v7x, f32 on v5e)
    # b2:     [1, H2] f32     w3: [H2, 1] bf16     b3: [1, 1] f32 in SMEM
    # out:    [tile_b, 1] f32 (cos_theta)
    x = x_ref[...].astype(jnp.bfloat16)

    # fc0 + ReLU: MXU matmul; bias/ReLU in bf16 where the VPU supports it
    # (h1 is consumed in bf16 by matmul2 anyway), f32 on v5e.
    ew = b1_ref.dtype
    h1 = jnp.dot(x, w1_ref[...], preferred_element_type=ew)          # [tile_b, H1]
    h1 = jnp.maximum(h1 + b1_ref[...], 0.0)

    # fc1 + ReLU, kept in f32 (feeds fc_out -> tanh -> arccos; accuracy path).
    h2 = jnp.dot(h1.astype(jnp.bfloat16), w2_ref[...],
                 preferred_element_type=jnp.float32)                 # [tile_b, H2]
    h2 = jnp.maximum(h2 + b2_ref[...], 0.0)

    # fc_out as an MXU matvec (N=1): same M/8 vmatmul pushes as a wide matmul,
    # no XLU rotate/add reduction tree competing for the vex slot.
    z = jnp.dot(h2.astype(jnp.bfloat16), w3_ref[...],
                preferred_element_type=jnp.float32)                  # [tile_b, 1]
    out_ref[...] = jnp.tanh(z + b3_ref[0, 0])                        # cos_theta


def tilt_regressor_forward(x, params, *, tile_b=None, max_tile_b=MAX_TILE_B):
    """Returns tilt_angle = arccos(tanh(fc_out(MLP(x)))) with shape [B, 1]."""
    w1, b1, w2, b2, w3, b3 = params
    batch, d_in = x.shape
    h1_dim = w1.shape[1]
    h2_dim = w2.shape[1]

    if tile_b is None:
        tile_b = _choose_tile_b(batch, max_tile_b)
    if tile_b % 8 != 0:
        raise ValueError(f"tile_b must be a multiple of 8, got {tile_b}")

    b_pad = _round_up(batch, tile_b)
    n_tiles = b_pad // tile_b

    ew = _elementwise_dtype()
    # Only the ragged last tile needs padding; padded (zero) rows are computed
    # and discarded by the [:batch] slice below.
    x_p = x if b_pad == batch else jnp.pad(x, ((0, b_pad - batch), (0, 0)))
    w1_bf = w1.astype(jnp.bfloat16)
    w2_bf = w2.astype(jnp.bfloat16)
    b1_e = b1.reshape(1, h1_dim).astype(ew)
    b2_f = b2.reshape(1, h2_dim).astype(jnp.float32)
    w3_col = w3.reshape(h2_dim, 1).astype(jnp.bfloat16)
    b3_s = b3.reshape(1, 1).astype(jnp.float32)

    cos_theta = pl.pallas_call(
        _tilt_kernel,
        grid=(n_tiles,),
        out_shape=jax.ShapeDtypeStruct((b_pad, 1), jnp.float32),
        in_specs=[
            pl.BlockSpec((tile_b, d_in), lambda i: (i, 0)),       # x: streamed
            pl.BlockSpec((d_in, h1_dim), lambda i: (0, 0)),       # W1: resident
            pl.BlockSpec((1, h1_dim), lambda i: (0, 0)),          # b1: resident
            pl.BlockSpec((h1_dim, h2_dim), lambda i: (0, 0)),     # W2: resident
            pl.BlockSpec((1, h2_dim), lambda i: (0, 0)),          # b2: resident
            pl.BlockSpec((h2_dim, 1), lambda i: (0, 0)),          # w3: resident
            pl.BlockSpec(memory_space=pltpu.MemorySpace.SMEM),    # b3 scalar
        ],
        out_specs=pl.BlockSpec((tile_b, 1), lambda i: (i, 0)),
        compiler_params=pltpu.CompilerParams(
            dimension_semantics=("parallel",)),
    )(x_p, w1_bf, b1_e, w2_bf, b2_f, w3_col, b3_s)

    # Tiny elementwise epilogue over [B, 1] (see TODO at top of file).
    return jnp.arccos(cos_theta[:batch])


def _reference_forward(x, params):
    """Pure-JAX f32 reference of the PyTorch forward pass."""
    w1, b1, w2, b2, w3, b3 = params
    h1 = jnp.maximum(x @ w1 + b1, 0.0)
    h2 = jnp.maximum(h1 @ w2 + b2, 0.0)
    return jnp.arccos(jnp.tanh(h2 @ w3 + b3))


def init_params(key, input_dim, hidden_dims=(256, 128)):
    """Parameter init mirroring the PyTorch module's shapes.

    Hidden-layer weights: kaiming-normal (std = sqrt(2 / fan_in)), stored as
    [in, out]. Hidden biases: uniform(-1/sqrt(fan_in), 1/sqrt(fan_in)) like
    nn.Linear's default. fc_out bias is constant 0.
    """
    params = []
    prev = input_dim
    for h in hidden_dims:
        key, kw, kb = jax.random.split(key, 3)
        std = (2.0 / prev) ** 0.5
        w = std * jax.random.normal(kw, (prev, h), dtype=jnp.float32)
        bound = 1.0 / (prev ** 0.5)
        b = jax.random.uniform(kb, (1, h), minval=-bound, maxval=bound,
                               dtype=jnp.float32)
        params += [w, b]
        prev = h
    key, kw = jax.random.split(key)
    bound = 1.0 / (prev ** 0.5)
    w_out = jax.random.uniform(kw, (prev, 1), minval=-bound, maxval=bound,
                               dtype=jnp.float32)
    b_out = jnp.zeros((1, 1), dtype=jnp.float32)
    params += [w_out, b_out]
    return tuple(params)


def _check(tilt, x, params, tol):
    assert tilt.shape == (x.shape[0], 1)
    assert bool(jnp.all(jnp.isfinite(tilt)))
    # Output is in [0, pi] by construction (arccos of tanh in (-1, 1)).
    assert bool(jnp.all(tilt >= 0.0)) and bool(jnp.all(tilt <= jnp.pi))
    ref = _reference_forward(x, params)
    # bf16 matmul inputs + f32 accumulation; note angle error <= error in the
    # pre-tanh logit (d/dz acos(tanh z) = -sech z), so arccos does not blow up.
    max_err = float(jnp.max(jnp.abs(tilt - ref)))
    assert max_err < tol, f"mismatch vs f32 reference: {max_err}"


if __name__ == "__main__":
    key = jax.random.PRNGKey(0)
    INPUT_DIM = 32
    HIDDEN_DIMS = (256, 128)

    key, kx1, kx2, kp = jax.random.split(key, 4)
    params = init_params(kp, INPUT_DIM, HIDDEN_DIMS)
    fwd = jax.jit(tilt_regressor_forward)

    # Small-batch path: single right-sized tile (no 1024-row padding).
    x_small = jax.random.normal(kx1, (8, INPUT_DIM), dtype=jnp.float32)
    tilt_small = fwd(x_small, params)
    jax.block_until_ready(tilt_small)
    _check(tilt_small, x_small, params, tol=0.08)

    # Multi-tile path: 2 streamed tiles (exercises padding + "parallel" grid).
    x_large = jax.random.normal(kx2, (600, INPUT_DIM), dtype=jnp.float32)
    tilt_large = fwd(x_large, params)
    jax.block_until_ready(tilt_large)
    _check(tilt_large, x_large, params, tol=0.1)

    print("KERNEL_OK")
</pallas_src>

<mosaic_0001>
module attributes {stable_mosaic.version = 11 : i64} {
  func.func @_tilt_kernel(%arg0: i32, %arg1: memref<8x32xf32, #tpu.memory_space<vmem>>, %arg2: memref<32x256xbf16, #tpu.memory_space<vmem>>, %arg3: memref<1x256xf32, #tpu.memory_space<vmem>>, %arg4: memref<256x128xbf16, #tpu.memory_space<vmem>>, %arg5: memref<1x128xf32, #tpu.memory_space<vmem>>, %arg6: memref<128x1xbf16, #tpu.memory_space<vmem>>, %arg7: memref<1x1xf32, #tpu.memory_space<smem>>, %arg8: memref<8x1xf32, #tpu.memory_space<vmem>>) attributes {dimension_semantics = [#tpu.dimension_semantics<parallel>], iteration_bounds = array<i64: 1>, scalar_prefetch = 0 : i64, scratch_operands = 0 : i64, tpu.core_type = #tpu.core_type<tc>, window_params = [{transform_indices = @transform_0, window_bounds = array<i64: 8, 32>}, {pipeline_mode = #tpu.pipeline_mode<synchronous>, transform_indices = @transform_1, window_bounds = array<i64: 32, 256>}, {pipeline_mode = #tpu.pipeline_mode<synchronous>, transform_indices = @transform_2, window_bounds = array<i64: 1, 256>}, {pipeline_mode = #tpu.pipeline_mode<synchronous>, transform_indices = @transform_3, window_bounds = array<i64: 256, 128>}, {pipeline_mode = #tpu.pipeline_mode<synchronous>, transform_indices = @transform_4, window_bounds = array<i64: 1, 128>}, {pipeline_mode = #tpu.pipeline_mode<synchronous>, transform_indices = @transform_5, window_bounds = array<i64: 128, 1>}, {transform_indices = @transform_6, window_bounds = array<i64: 1, 1>}, {transform_indices = @transform_7, window_bounds = array<i64: 8, 1>}]} {
    %c0 = arith.constant 0 : index
    %c0_0 = arith.constant 0 : index
    %0 = vector.load %arg1[%c0, %c0_0] : memref<8x32xf32, #tpu.memory_space<vmem>>, vector<8x32xf32>
    %1 = arith.truncf %0 : vector<8x32xf32> to vector<8x32xbf16>
    %c0_1 = arith.constant 0 : index
    %c0_2 = arith.constant 0 : index
    %2 = vector.load %arg2[%c0_1, %c0_2] : memref<32x256xbf16, #tpu.memory_space<vmem>>, vector<32x256xbf16>
    %cst = arith.constant dense<0.000000e+00> : vector<8x256xf32>
    %3 = tpu.matmul %1, %2, %cst {dimension_numbers = #tpu.dot_dimension_numbers<[1], [0], [0], [1], [0, 0, 1, 1], [], []>} : vector<8x32xbf16>, vector<32x256xbf16>, vector<8x256xf32> -> vector<8x256xf32>
    %c0_3 = arith.constant 0 : index
    %c0_4 = arith.constant 0 : index
    %4 = vector.load %arg3[%c0_3, %c0_4] : memref<1x256xf32, #tpu.memory_space<vmem>>, vector<1x256xf32>
    %5 = vector.broadcast %4 : vector<1x256xf32> to vector<8x256xf32>
    %6 = arith.addf %3, %5 : vector<8x256xf32>
    %cst_5 = arith.constant 0.000000e+00 : f32
    %7 = vector.broadcast %cst_5 : f32 to vector<8x256xf32>
    %8 = arith.maximumf %6, %7 : vector<8x256xf32>
    %9 = arith.truncf %8 : vector<8x256xf32> to vector<8x256xbf16>
    %c0_6 = arith.constant 0 : index
    %c0_7 = arith.constant 0 : index
    %10 = vector.load %arg4[%c0_6, %c0_7] : memref<256x128xbf16, #tpu.memory_space<vmem>>, vector<256x128xbf16>
    %cst_8 = arith.constant dense<0.000000e+00> : vector<8x128xf32>
    %11 = tpu.matmul %9, %10, %cst_8 {dimension_numbers = #tpu.dot_dimension_numbers<[1], [0], [0], [1], [0, 0, 1, 1], [], []>} : vector<8x256xbf16>, vector<256x128xbf16>, vector<8x128xf32> -> vector<8x128xf32>
    %c0_9 = arith.constant 0 : index
    %c0_10 = arith.constant 0 : index
    %12 = vector.load %arg5[%c0_9, %c0_10] : memref<1x128xf32, #tpu.memory_space<vmem>>, vector<1x128xf32>
    %13 = vector.broadcast %12 : vector<1x128xf32> to vector<8x128xf32>
    %14 = arith.addf %11, %13 : vector<8x128xf32>
    %cst_11 = arith.constant 0.000000e+00 : f32
    %15 = vector.broadcast %cst_11 : f32 to vector<8x128xf32>
    %16 = arith.maximumf %14, %15 : vector<8x128xf32>
    %17 = arith.truncf %16 : vector<8x128xf32> to vector<8x128xbf16>
    %c0_12 = arith.constant 0 : index
    %c0_13 = arith.constant 0 : index
    %18 = vector.load %arg6[%c0_12, %c0_13] : memref<128x1xbf16, #tpu.memory_space<vmem>>, vector<128x1xbf16>
    %cst_14 = arith.constant dense<0.000000e+00> : vector<8x1xf32>
    %19 = tpu.matmul %17, %18, %cst_14 {dimension_numbers = #tpu.dot_dimension_numbers<[1], [0], [0], [1], [0, 0, 1, 1], [], []>} : vector<8x128xbf16>, vector<128x1xbf16>, vector<8x1xf32> -> vector<8x1xf32>
    %c0_15 = arith.constant 0 : index
    %c0_16 = arith.constant 0 : index
    %20 = memref.load %arg7[%c0_15, %c0_16] : memref<1x1xf32, #tpu.memory_space<smem>>
    %21 = vector.broadcast %20 : f32 to vector<8x1xf32>
    %22 = arith.addf %19, %21 : vector<8x1xf32>
    %23 = math.tanh %22 : vector<8x1xf32>
    %c0_17 = arith.constant 0 : index
    %c0_18 = arith.constant 0 : index
    %24 = vector.load %arg8[%c0_17, %c0_18] : memref<8x1xf32, #tpu.memory_space<vmem>>, vector<8x1xf32>
    tpu.vector_store %arg8[%c0_17, %c0_18], %23 {strides = array<i32>} : memref<8x1xf32, #tpu.memory_space<vmem>>, vector<8x1xf32>,
    return
  }
  func.func @transform_0(%arg0: i32) -> (i32, i32) {
    %c0_i32 = arith.constant 0 : i32
    %c0_i32_0 = arith.constant 0 : i32
    return %arg0, %c0_i32 : i32, i32
  }
  func.func @transform_1(%arg0: i32) -> (i32, i32) {
    %c0_i32 = arith.constant 0 : i32
    %c0_i32_0 = arith.constant 0 : i32
    %c0_i32_1 = arith.constant 0 : i32
    return %c0_i32, %c0_i32_0 : i32, i32
  }
  func.func @transform_2(%arg0: i32) -> (i32, i32) {
    %c0_i32 = arith.constant 0 : i32
    %c0_i32_0 = arith.constant 0 : i32
    %c0_i32_1 = arith.constant 0 : i32
    return %c0_i32, %c0_i32_0 : i32, i32
  }
  func.func @transform_3(%arg0: i32) -> (i32, i32) {
    %c0_i32 = arith.constant 0 : i32
    %c0_i32_0 = arith.constant 0 : i32
    %c0_i32_1 = arith.constant 0 : i32
    return %c0_i32, %c0_i32_0 : i32, i32
  }
  func.func @transform_4(%arg0: i32) -> (i32, i32) {
    %c0_i32 = arith.constant 0 : i32
    %c0_i32_0 = arith.constant 0 : i32
    %c0_i32_1 = arith.constant 0 : i32
    return %c0_i32, %c0_i32_0 : i32, i32
  }
  func.func @transform_5(%arg0: i32) -> (i32, i32) {
    %c0_i32 = arith.constant 0 : i32
    %c0_i32_0 = arith.constant 0 : i32
    %c0_i32_1 = arith.constant 0 : i32
    return %c0_i32, %c0_i32_0 : i32, i32
  }
  func.func @transform_6(%arg0: i32) -> (i32, i32) {
    %c0_i32 = arith.constant 0 : i32
    %c0_i32_0 = arith.constant 0 : i32
    %c0_i32_1 = arith.constant 0 : i32
    return %c0_i32, %c0_i32_0 : i32, i32
  }
  func.func @transform_7(%arg0: i32) -> (i32, i32) {
    %c0_i32 = arith.constant 0 : i32
    %c0_i32_0 = arith.constant 0 : i32
    return %arg0, %c0_i32 : i32, i32
  }
}

</mosaic_0001>

<bundles_post_ra>
// kernel: tilt_regressor_forward.1
= control target key start
LH: loop header
LB: loop body
LE: loop exit
PB: predicated region body
PF: predicated region fallthrough
CT: control target
= control target key end

     0   :  { %v521_v1 = vmov 0   ;;  %vm66_vm0 = vcmask 261120   ;;  %v522_v23 = vmov 0.0   ;;  %v36_v30 = vlaneseq  ;;  %s663_s1 = inlined_call_operand.vmem [shape: bf16[32,256], index: 1, kind: input, shape index: {}]   ;;  %s664_s0 = inlined_call_operand.vmem [shape: f32[8,32], index: 0, kind: input, shape index: {}]   ;;  %s665_s3 = inlined_call_operand.vmem [shape: bf16[256,128], index: 3, kind: input, shape index: {}]   ;;  %s666_s5 = inlined_call_operand.vmem [shape: bf16[128,1], index: 5, kind: input, shape index: {}]   ;;  %s667_s2 = inlined_call_operand.vmem [shape: f32[1,256], index: 2, kind: input, shape index: {}]   ;;  %s668_s4 = inlined_call_operand.vmem [shape: f32[1,128], index: 4, kind: input, shape index: {}]   ;;  %s669_s6 = inlined_call_operand.<no memory space> [shape: f32[1,1], index: 6, kind: input, shape index: {}]   ;;  %s670_s7 = inlined_call_operand.vmem [shape: f32[8,1], index: 7, kind: output, shape index: {}]  }
   0x1   :  { %v489_v0 = vld [vmem:[%s663_s1 + $0x4] ss:$8 sps:$4 sm:$0xff]   ;;  %102 = vmatprep.mubr.bf16.mxu0 %v521_v1  ;;  %v491_v2 = vld [vmem:[%s663_s1] ss:$8 sps:$4 sm:$0xff]   ;;  %v492_v3 = vld [vmem:[%s663_s1 + $0x14] ss:$8 sps:$4 sm:$0xff]   ;;  %v309_v58 = vstv %s669_s6 }
   0x2   :  { %70 = vmatprep.subr.bf16.mxu0 %v489_v0  ;;  %v494_v4 = vld [vmem:[%s663_s1 + $0x10] ss:$8 sps:$4 sm:$0xff]   ;;  %v28_v5 = vld [vmem:[%s664_s0] sm:$0xff]  ;;  %v497_v8 = vld [vmem:[%s665_s3 + $0x48] sm:$0xff]   ;;  %v37_v31 = vshrl.u32 %v36_v30, 7  ;;  %vm523_vm1 = vmmov 0  }
   0x3   :  { %71 = vmatpush1.bf16.msra.mxu0 %v491_v2  ;;  %v495_v6 = vld [vmem:[%s665_s3 + $0x40] sm:$0xff]   ;;  %v29_v9 = vpack.c.bf16 %v28_v5, %v28_v5  ;;  %v498_v10 = vld [vmem:[%s665_s3 + $0x8] sm:$0xff]   ;;  %v499_v11 = vld [vmem:[%s665_s3 + $0x50] sm:$0xff]   ;;  %vm399_vm2 = vcmask 7168  }
   0x4   :  { %72 = vmatprep.subr.bf16.mxu0 %v492_v3  ;;  %v496_v7 = vld [vmem:[%s665_s3] sm:$0xff]   ;;  %435 = vmatprep.subr.bf16.mxu1 %v495_v6  ;;  %v500_v12 = vld [vmem:[%s665_s3 + $0x10] sm:$0xff]   ;;  %v501_v13 = vld [vmem:[%s665_s3 + $0x58] sm:$0xff]   ;;  %v38_v32 = vsub.s32 0, %v37_v31  ;;  %v42_v34 = vsub.s32 1, %v37_v31 }
   0x5   :  { %436 = vmatpush3.bf16.msra.mxu1 %v496_v7  ;;  %v502_v14 = vld [vmem:[%s665_s3 + $0x18] sm:$0xff]   ;;  %v503_v15 = vld [vmem:[%s665_s3 + $0x60] sm:$0xff]   ;;  %v505_v17 = vld [vmem:[%s665_s3 + $0x68] sm:$0xff]  }
   0x6   :  { %437 = vmatprep.subr.bf16.mxu1 %v497_v8  ;;  %v504_v16 = vld [vmem:[%s665_s3 + $0x20] sm:$0xff]   ;;  %v506_v18 = vld [vmem:[%s665_s3 + $0x28] sm:$0xff]   ;;  %v507_v19 = vld [vmem:[%s665_s3 + $0x70] sm:$0xff]  }
   0x7   :  { %73 = vmatpush1.bf16.msra.mxu0 %v494_v4  ;;  %v508_v20 = vld [vmem:[%s665_s3 + $0x30] sm:$0xff]   ;;  %v509_v21 = vld [vmem:[%s665_s3 + $0x78] sm:$0xff]   ;;  %v511_v24 = vld [vmem:[%s666_s5] sm:$0xff]  }
   0x8   :  { %v510_v22 = vld [vmem:[%s665_s3 + $0x38] sm:$0xff]   ;;  %466 = vmatprep.subr.bf16.mxu0 %v522_v23  ;;  %v512_v25 = vld [vmem:[%s666_s5 + $0x8] sm:$0xff]   ;;  %v513_v26 = vld [vmem:[%s666_s5 + $0x10] sm:$0xff]  }
   0x9   :  { %438 = vmatpush3.bf16.msra.mxu1 %v498_v10  ;;  %v514_v27 = vld [vmem:[%s666_s5 + $0x18] sm:$0xff]   ;;  %v515_v28 = vld [vmem:[%s666_s5 + $0x20] sm:$0xff]   ;;  %v516_v29 = vld [vmem:[%s666_s5 + $0x28] sm:$0xff]  }
   0xa   :  { %409 = vmatmul.mubr.msk.bf16.vlgmr.msra.gmra.mrb[0].mxu0 %vm66_vm0, %v29_v9  ;;  %439 = vmatprep.subr.bf16.mxu1 %v499_v11  ;;  %v34_v33 = vld [vmem:[%s667_s2] sm:$0x3]  ;;  %v517_v47 = vld [vmem:[%s666_s5 + $0x30] sm:$0xff]   ;;  %v518_v48 = vld [vmem:[%s666_s5 + $0x38] sm:$0xff]  }
   0xb   :  { %467 = vmatpush3.bf16.msra.mxu0 %v511_v24  ;;  %v39_v35 = vrot.slane %v34_v33, %v38_v32  ;;  %v43_v36 = vrot.slane %v34_v33, %v42_v34  ;;  %482 = vmatprep.mubr.msk.bf16.mxu0 %vm523_vm1, %v522_v23  ;;  %v410_v50 = vld [vmem:[%s668_s4] ss:$0 sm:$0xff] }
   0xc   :  { %468 = vmatprep.subr.bf16.mxu0 %v522_v23 }
   0xd   :  { %440 = vmatpush3.bf16.msra.mxu1 %v500_v12 }
   0xe   :  { %441 = vmatprep.subr.bf16.mxu1 %v501_v13 }
   0xf   :  { %469 = vmatpush3.bf16.msra.mxu0 %v512_v25 }
  0x10   :  { %470 = vmatprep.subr.bf16.mxu0 %v522_v23 }
  0x11   :  { %442 = vmatpush3.bf16.msra.mxu1 %v502_v14 }
  0x12   :  { %443 = vmatprep.subr.bf16.mxu1 %v503_v15 }
  0x13   :  { %471 = vmatpush3.bf16.msra.mxu0 %v513_v26 }
  0x14   :  { %472 = vmatprep.subr.bf16.mxu0 %v522_v23 }
  0x15   :  { %444 = vmatpush3.bf16.msra.mxu1 %v504_v16 }
  0x16   :  { %445 = vmatprep.subr.bf16.mxu1 %v505_v17 }
  0x17   :  { %473 = vmatpush3.bf16.msra.mxu0 %v514_v27 }
  0x18   :  { %474 = vmatprep.subr.bf16.mxu0 %v522_v23 }
  0x19   :  { %446 = vmatpush3.bf16.msra.mxu1 %v506_v18 }
  0x1a   :  { %447 = vmatprep.subr.bf16.mxu1 %v507_v19 }
  0x1b   :  { %475 = vmatpush3.bf16.msra.mxu0 %v515_v28 }
  0x1c   :  { %476 = vmatprep.subr.bf16.mxu0 %v522_v23 }
  0x1d   :  { %448 = vmatpush3.bf16.msra.mxu1 %v508_v20 }
  0x1e   :  { %449 = vmatprep.subr.bf16.mxu1 %v509_v21 }
  0x1f   :  { %477 = vmatpush3.bf16.msra.mxu0 %v516_v29 }
  0x20   :  { %478 = vmatprep.subr.bf16.mxu0 %v522_v23 }
  0x21   :  { %450 = vmatpush3.bf16.msra.mxu1 %v510_v22 }
  0x23   :  { %479 = vmatpush3.bf16.msra.mxu0 %v517_v47 }
  0x24   :  { %480 = vmatprep.subr.bf16.mxu0 %v522_v23 }
  0x27   :  { %481 = vmatpush3.bf16.msra.mxu0 %v518_v48 }
  0xdd   :  { %v104_v37 = vpop.f32.mrb[0].mxu0 }
  0xde   :  { %v105_v38 = vadd.f32 %v104_v37, %v39_v35  ;;  %v106_v39 = vpop.f32.mrb[1].mxu0 }
  0xdf   :  { %v107_v40 = vadd.f32 %v106_v39, %v43_v36  ;;  %v108_v41 = vpop.f32.mrb[2].mxu0 }
  0xe0   :  { %v111_v42 = vmax.f32 %v105_v38, 0.0  ;;  %v109_v43 = vpop.f32.mrb[3].mxu0 }
  0xe1   :  { %v112_v44 = vmax.f32 %v107_v40, 0.0 }
  0xe2   :  { %v113_v46 = vpack.c.bf16 %v111_v42, %v111_v42 }
  0xe3   :  { %v114_v45 = vpack.c.bf16 %v112_v44, %v112_v44 }
  0xe5   :  { %282 = vmatprep.mubr.bf16.mxu1 %v114_v45 }
  0xe6   :  { %283 = vmatmul.mubr.bf16.vlgmr.msra.gmra.mrb[0].mxu1 %v113_v46 }
 0x1b9   :  { %v451_v49 = vpop.f32.mrb[0].mxu1 }
 0x1ba   :  { %v452_v51 = vpop.f32.mrb[1].mxu1 }
 0x1bb   :  { %v453_v52 = vadd.f32 %v452_v51, %v451_v49  ;;  %v454_v53 = vpop.f32.mrb[2].mxu1 }
 0x1bc   :  { %v455_v54 = vpop.f32.mrb[3].mxu1 }
 0x1bd   :  { %v285_v55 = vadd.f32 %v453_v52, %v410_v50 }
 0x1bf   :  { %v290_v56 = vmax.f32 %v285_v55, 0.0 }
 0x1c1   :  { %v291_v57 = vpack.c.bf16 %v290_v56, %v290_v56 }
 0x1c3   :  { %483 = vmatmul.mubr.bf16.vlgmr.msra.gmra.mrb[4].mxu0 %v291_v57 }
 0x296   :  { %v392_v59 = vpop.f32.mrb[4].mxu0 }
 0x297   :  { %v393_v60 = vadd.f32 %v392_v59, %v309_v58  ;;  %v484_v61 = vpop.f32.mrb[5].mxu0 }
 0x298   :  { %v395_v62 = vpop.f32.mrb[6].mxu0 }
 0x299   :  { %519 = vtanh.f32 %v393_v60  ;;  %v485_v63 = vpop.f32.mrb[7].mxu0 }
 0x2a3   :  { %v520_v0 = vpop.eup %519 }
 0x2a4   :  { %400 = vst.msk [vmem:[%s670_s7] sm:$0xff] %vm399_vm2, %v520_v0 }

</bundles_post_ra>
